<compile_context>
chip_gen: v5e
topology: v5e:2x2
jax: 0.10.0
libtpu: 0.0.40
codegen_flags: <defaults>
</compile_context>

<pallas_src>
import functools
import math

import jax
import jax.numpy as jnp
from jax.experimental import pallas as pl
from jax.experimental.pallas import tpu as pltpu


# ----------------------------------------------------------------------------
# Tiling helpers
# ----------------------------------------------------------------------------
def _round_up(x, m):
    return ((x + m - 1) // m) * m


def _tile(dim, pref, align):
    """Pick (tile, padded_dim): tile is a multiple of `align`, <= ~pref,
    padded_dim is a multiple of tile and >= dim (minimal padding)."""
    d = _round_up(dim, align)
    if d <= pref:
        return d, d
    best_t, best_pad = None, None
    t = max(align, (pref // align) * align)
    while t >= align:
        pad = _round_up(d, t) - d
        if best_pad is None or pad < best_pad:
            best_t, best_pad = t, pad
        if pad == 0:
            break
        t -= align
    return best_t, _round_up(d, best_t)


_VMEM_LIMIT = 32 * 1024 * 1024  # explicit, safely under v7x's 64 MiB physical


# ----------------------------------------------------------------------------
# Tiled fused matmul + bias (+ ReLU) kernel: out = act(x @ w + b)
# ----------------------------------------------------------------------------
def _mm_bias_act_kernel(x_ref, w_ref, b_ref, o_ref, acc_ref, *, apply_relu):
    k = pl.program_id(2)

    @pl.when(k == 0)
    def _():
        acc_ref[...] = jnp.zeros_like(acc_ref)

    acc_ref[...] += jnp.dot(x_ref[...], w_ref[...],
                            preferred_element_type=jnp.float32)

    @pl.when(k == pl.num_programs(2) - 1)
    def _():
        out = acc_ref[...] + b_ref[...]          # bias/epilogue in f32 vregs
        if apply_relu:
            out = jnp.maximum(out, 0.0)
        o_ref[...] = out.astype(o_ref.dtype)


def matmul_bias_act(x, w, b, *, apply_relu, out_dtype=jnp.float32,
                    tm_pref=256, tk_pref=512, tn_pref=256):
    """act(x @ w + b); x:(M,K) w:(K,N) b:(N,).  bf16 operands, f32 accumulate."""
    M, K = x.shape
    K2, N = w.shape
    assert K == K2, (K, K2)

    tm, Mp = _tile(M, tm_pref, 8)
    tk, Kp = _tile(K, tk_pref, 128)
    tn, Np = _tile(N, tn_pref, 128)

    xp = jnp.pad(x.astype(jnp.bfloat16), ((0, Mp - M), (0, Kp - K)))
    wp = jnp.pad(w.astype(jnp.bfloat16), ((0, Kp - K), (0, Np - N)))
    bp = jnp.pad(b.astype(jnp.float32).reshape(1, N), ((0, 0), (0, Np - N)))

    kernel = functools.partial(_mm_bias_act_kernel, apply_relu=apply_relu)
    out = pl.pallas_call(
        kernel,
        out_shape=jax.ShapeDtypeStruct((Mp, Np), out_dtype),
        grid_spec=pltpu.PrefetchScalarGridSpec(
            num_scalar_prefetch=0,
            grid=(Mp // tm, Np // tn, Kp // tk),
            in_specs=[
                pl.BlockSpec((tm, tk), lambda i, j, k: (i, k)),
                pl.BlockSpec((tk, tn), lambda i, j, k: (k, j)),
                pl.BlockSpec((1, tn), lambda i, j, k: (0, j)),
            ],
            out_specs=pl.BlockSpec((tm, tn), lambda i, j, k: (i, j)),
            scratch_shapes=[pltpu.VMEM((tm, tn), jnp.float32)],
        ),
        compiler_params=pltpu.CompilerParams(
            dimension_semantics=("parallel", "parallel", "arbitrary"),
            vmem_limit_bytes=_VMEM_LIMIT,
        ),
    )(xp, wp, bp)
    return out[:M, :N]


# ----------------------------------------------------------------------------
# Fused fc (+ReLU) + critic head kernel
# ----------------------------------------------------------------------------
def _fc_critic_kernel(x_ref, w_ref, b_ref, cw_ref, cb_ref,
                      feat_ref, crit_ref, acc_ref):
    k = pl.program_id(1)

    @pl.when(k == 0)
    def _():
        acc_ref[...] = jnp.zeros_like(acc_ref)

    acc_ref[...] += jnp.dot(x_ref[...], w_ref[...],
                            preferred_element_type=jnp.float32)

    @pl.when(k == pl.num_programs(1) - 1)
    def _():
        h = jnp.maximum(acc_ref[...] + b_ref[...], 0.0)      # fc + ReLU (f32)
        feat_ref[...] = h.astype(feat_ref.dtype)
        # critic matvec on the VMEM-resident feature tile (f32 for precision)
        c = jnp.dot(h, cw_ref[...], preferred_element_type=jnp.float32)
        crit_ref[...] = (c + cb_ref[...]).astype(crit_ref.dtype)


def fc_critic(x, fc_w, fc_b, cw, cb, *, tm_pref=256, tk_pref=512):
    """feat = relu(x @ fc_w + fc_b); critic = feat @ cw + cb, in one kernel."""
    M, K = x.shape
    K2, N = fc_w.shape
    assert K == K2
    N2, C = cw.shape
    assert N == N2

    tm, Mp = _tile(M, tm_pref, 8)
    tk, Kp = _tile(K, tk_pref, 128)
    Np = _round_up(N, 128)   # fc output kept as a single resident lane-dense tile
    Cp = _round_up(C, 128)   # critic output padded to 128 lanes (no masked vst)

    xp = jnp.pad(x.astype(jnp.bfloat16), ((0, Mp - M), (0, Kp - K)))
    wp = jnp.pad(fc_w.astype(jnp.bfloat16), ((0, Kp - K), (0, Np - N)))
    bp = jnp.pad(fc_b.astype(jnp.float32).reshape(1, N), ((0, 0), (0, Np - N)))
    cwp = jnp.pad(cw.astype(jnp.float32), ((0, Np - N), (0, Cp - C)))
    cbp = jnp.pad(cb.astype(jnp.float32).reshape(1, C), ((0, 0), (0, Cp - C)))

    feat, crit = pl.pallas_call(
        _fc_critic_kernel,
        out_shape=(jax.ShapeDtypeStruct((Mp, Np), jnp.float32),
                   jax.ShapeDtypeStruct((Mp, Cp), jnp.float32)),
        grid_spec=pltpu.PrefetchScalarGridSpec(
            num_scalar_prefetch=0,
            grid=(Mp // tm, Kp // tk),
            in_specs=[
                pl.BlockSpec((tm, tk), lambda i, k: (i, k)),
                pl.BlockSpec((tk, Np), lambda i, k: (k, 0)),
                pl.BlockSpec((1, Np), lambda i, k: (0, 0)),
                pl.BlockSpec((Np, Cp), lambda i, k: (0, 0)),
                pl.BlockSpec((1, Cp), lambda i, k: (0, 0)),
            ],
            out_specs=[
                pl.BlockSpec((tm, Np), lambda i, k: (i, 0)),
                pl.BlockSpec((tm, Cp), lambda i, k: (i, 0)),
            ],
            scratch_shapes=[pltpu.VMEM((tm, Np), jnp.float32)],
        ),
        compiler_params=pltpu.CompilerParams(
            dimension_semantics=("parallel", "arbitrary"),
            vmem_limit_bytes=_VMEM_LIMIT,
        ),
    )(xp, wp, bp, cwp, cbp)
    return feat[:M, :N], crit[:M, :C]


# ----------------------------------------------------------------------------
# Conv3d (+ReLU): channels-last patch gather (slice+concat only) + Pallas GEMM
# ----------------------------------------------------------------------------
def conv3d_relu_ndhwc(x, w, b, stride, padding):
    """x:(N,D,H,W,C)  w:(Cout,C,kD,kH,kW)  b:(Cout,) -> (N,Do,Ho,Wo,Cout) bf16."""
    N, D, H, W, C = x.shape
    Cout, _, kD, kH, kW = w.shape
    sD, sH, sW = stride
    pD, pH, pW = padding
    xp = jnp.pad(x, ((0, 0), (pD, pD), (pH, pH), (pW, pW), (0, 0)))
    Do = (D + 2 * pD - kD) // sD + 1
    Ho = (H + 2 * pH - kH) // sH + 1
    Wo = (W + 2 * pW - kW) // sW + 1

    # Patch matrix directly in channels-last order: K order = (kd, kh, kw, c).
    # Pure slices + one concat along the lane axis -> no activation transpose.
    cols = jnp.concatenate(
        [xp[:, kd: kd + sD * Do: sD,
               kh: kh + sH * Ho: sH,
               kw: kw + sW * Wo: sW, :]
         for kd in range(kD) for kh in range(kH) for kw in range(kW)],
        axis=-1,
    ).reshape(N * Do * Ho * Wo, kD * kH * kW * C)

    # Permute the (small) weight to the matching (kd, kh, kw, c) K order.
    wmat = w.transpose(2, 3, 4, 1, 0).reshape(kD * kH * kW * C, Cout)

    out = matmul_bias_act(cols, wmat, b, apply_relu=True,
                          out_dtype=jnp.bfloat16)
    return out.reshape(N, Do, Ho, Wo, Cout)


# ----------------------------------------------------------------------------
# Network (JAX/Pallas port of the PyTorch module)
# ----------------------------------------------------------------------------
def _orthogonal(key, shape2d, gain):
    return jax.nn.initializers.orthogonal(scale=gain)(key, shape2d, jnp.float32)


class Network:
    """Conv3d stack (+ReLU) -> Flatten -> Linear(+ReLU) -> critic Linear."""

    def __init__(self, num_inputs, num_outputs, paraslist, key):
        # num_inputs = [H, W, D, C]
        relu_gain = math.sqrt(2.0)  # nn.init.calculate_gain('relu')
        H, W, D, C = num_inputs[0], num_inputs[1], num_inputs[2], num_inputs[3]
        layer_inputs = C
        self.conv_params = []  # (weight(PyTorch layout), bias, stride, padding)

        keys = jax.random.split(key, len(paraslist) + 2)
        for i, paras in enumerate(paraslist):
            para = [int(p) for p in paras.split(',')]
            kH, kW, kD = para[0], para[1], para[2]
            sH, sW, sD = para[3], para[4], para[5]
            pH, pW, pD = para[6], para[7], para[8]
            Cout = para[9]

            Kdim = layer_inputs * kD * kH * kW
            w2d = _orthogonal(keys[i], (Cout, Kdim), relu_gain)
            w = w2d.reshape(Cout, layer_inputs, kD, kH, kW)
            b = jnp.zeros((Cout,), jnp.float32)
            self.conv_params.append((w, b, (sD, sH, sW), (pD, pH, pW)))

            H = (H + 2 * pH - kH) // sH + 1
            W = (W + 2 * pW - kW) // sW + 1
            D = (D + 2 * pD - kD) // sD + 1
            layer_inputs = Cout

        flat_dim = layer_inputs * D * H * W
        # fc weight rows follow the NDHWC flatten order (D,H,W,C); for a
        # random orthogonal init this is the same architecture as PyTorch's
        # (C,D,H,W) flatten up to a fixed row permutation.
        self.fc_w = _orthogonal(keys[-2], (flat_dim, num_outputs), relu_gain)
        self.fc_b = jnp.zeros((num_outputs,), jnp.float32)
        self.critic_w = _orthogonal(keys[-1], (num_outputs, 1), 1.0)
        self.critic_b = jnp.zeros((1,), jnp.float32)
        self.num_outputs = num_outputs

    def forward(self, inputs):
        # inputs: (N, C, D, H, W) -- PyTorch NCDHW interface.
        x = jnp.transpose(inputs, (0, 2, 3, 4, 1)).astype(jnp.bfloat16)  # NDHWC
        for w, b, stride, padding in self.conv_params:
            x = conv3d_relu_ndhwc(x, w, b, stride, padding)
        n = x.shape[0]
        x = x.reshape(n, -1)                       # flatten (D,H,W,C)
        feat, critic = fc_critic(x, self.fc_w, self.fc_b,
                                 self.critic_w, self.critic_b)
        return critic, feat


# ----------------------------------------------------------------------------
if __name__ == "__main__":
    key = jax.random.PRNGKey(0)
    k_params, k_input = jax.random.split(key)

    # num_inputs = [H, W, D, C]
    num_inputs = [8, 8, 4, 3]
    num_outputs = 32
    # para = kH,kW,kD,sH,sW,sD,pH,pW,pD,Cout
    paraslist = ["3,3,2,2,2,1,1,1,0,8", "3,3,3,1,1,1,1,1,1,16"]

    net = Network(list(num_inputs), num_outputs, paraslist, k_params)

    batch = 2
    x = jax.random.normal(
        k_input,
        (batch, num_inputs[3], num_inputs[2], num_inputs[0], num_inputs[1]),
        jnp.float32,
    )  # (N, C, D, H, W)

    fwd = jax.jit(net.forward)
    critic, feat = fwd(x)
    jax.block_until_ready((critic, feat))

    assert critic.shape == (batch, 1), critic.shape
    assert feat.shape == (batch, num_outputs), feat.shape
    assert bool(jnp.all(jnp.isfinite(critic))) and bool(jnp.all(jnp.isfinite(feat)))
    print("KERNEL_OK")
</pallas_src>

<mosaic_0001>
module attributes {stable_mosaic.version = 11 : i64} {
  func.func @_mm_bias_act_kernel(%arg0: i32, %arg1: i32, %arg2: i32, %arg3: memref<96x128xbf16, #tpu.memory_space<vmem>>, %arg4: memref<128x128xbf16, #tpu.memory_space<vmem>>, %arg5: memref<1x128xf32, #tpu.memory_space<vmem>>, %arg6: memref<96x128xbf16, #tpu.memory_space<vmem>>, %arg7: memref<96x128xf32, #tpu.memory_space<vmem>>) attributes {dimension_semantics = [#tpu.dimension_semantics<parallel>, #tpu.dimension_semantics<parallel>, #tpu.dimension_semantics<arbitrary>], iteration_bounds = array<i64: 1, 1, 1>, scalar_prefetch = 0 : i64, scratch_operands = 1 : i64, tpu.core_type = #tpu.core_type<tc>, window_params = [{transform_indices = @transform_0, window_bounds = array<i64: 96, 128>}, {transform_indices = @transform_1, window_bounds = array<i64: 128, 128>}, {transform_indices = @transform_2, window_bounds = array<i64: 1, 128>}, {transform_indices = @transform_3, window_bounds = array<i64: 96, 128>}]} {
    %c0_i32 = arith.constant 0 : i32
    %0 = arith.cmpi eq, %arg2, %c0_i32 : i32
    %1 = arith.extui %0 : i1 to i32
    %c0_i32_0 = arith.constant 0 : i32
    %2 = arith.cmpi ne, %1, %c0_i32_0 : i32
    scf.if %2 {
      %cst_10 = arith.constant 0.000000e+00 : f32
      %12 = vector.broadcast %cst_10 : f32 to vector<96x128xf32>
      %c0_11 = arith.constant 0 : index
      %c0_12 = arith.constant 0 : index
      %13 = vector.load %arg7[%c0_11, %c0_12] : memref<96x128xf32, #tpu.memory_space<vmem>>, vector<96x128xf32>
      tpu.vector_store %arg7[%c0_11, %c0_12], %12 {strides = array<i32>} : memref<96x128xf32, #tpu.memory_space<vmem>>, vector<96x128xf32>,
    } else {
    }
    %c0 = arith.constant 0 : index
    %c0_1 = arith.constant 0 : index
    %3 = vector.load %arg7[%c0, %c0_1] : memref<96x128xf32, #tpu.memory_space<vmem>>, vector<96x128xf32>
    %c0_2 = arith.constant 0 : index
    %c0_3 = arith.constant 0 : index
    %4 = vector.load %arg3[%c0_2, %c0_3] : memref<96x128xbf16, #tpu.memory_space<vmem>>, vector<96x128xbf16>
    %c0_4 = arith.constant 0 : index
    %c0_5 = arith.constant 0 : index
    %5 = vector.load %arg4[%c0_4, %c0_5] : memref<128x128xbf16, #tpu.memory_space<vmem>>, vector<128x128xbf16>
    %cst = arith.constant dense<0.000000e+00> : vector<96x128xf32>
    %6 = tpu.matmul %4, %5, %cst {dimension_numbers = #tpu.dot_dimension_numbers<[1], [0], [0], [1], [0, 0, 1, 1], [], []>} : vector<96x128xbf16>, vector<128x128xbf16>, vector<96x128xf32> -> vector<96x128xf32>
    %7 = arith.addf %3, %6 : vector<96x128xf32>
    %c0_6 = arith.constant 0 : index
    %c0_7 = arith.constant 0 : index
    %8 = vector.load %arg7[%c0_6, %c0_7] : memref<96x128xf32, #tpu.memory_space<vmem>>, vector<96x128xf32>
    tpu.vector_store %arg7[%c0_6, %c0_7], %7 {strides = array<i32>} : memref<96x128xf32, #tpu.memory_space<vmem>>, vector<96x128xf32>,
    %c0_i32_8 = arith.constant 0 : i32
    %9 = arith.cmpi eq, %arg2, %c0_i32_8 : i32
    %10 = arith.extui %9 : i1 to i32
    %c0_i32_9 = arith.constant 0 : i32
    %11 = arith.cmpi ne, %10, %c0_i32_9 : i32
    scf.if %11 {
      %c0_10 = arith.constant 0 : index
      %c0_11 = arith.constant 0 : index
      %12 = vector.load %arg7[%c0_10, %c0_11] : memref<96x128xf32, #tpu.memory_space<vmem>>, vector<96x128xf32>
      %c0_12 = arith.constant 0 : index
      %c0_13 = arith.constant 0 : index
      %13 = vector.load %arg5[%c0_12, %c0_13] : memref<1x128xf32, #tpu.memory_space<vmem>>, vector<1x128xf32>
      %14 = vector.broadcast %13 : vector<1x128xf32> to vector<96x128xf32>
      %15 = arith.addf %12, %14 : vector<96x128xf32>
      %cst_14 = arith.constant 0.000000e+00 : f32
      %16 = vector.broadcast %cst_14 : f32 to vector<96x128xf32>
      %17 = arith.maximumf %15, %16 : vector<96x128xf32>
      %18 = arith.truncf %17 : vector<96x128xf32> to vector<96x128xbf16>
      %c0_15 = arith.constant 0 : index
      %c0_16 = arith.constant 0 : index
      %19 = vector.load %arg6[%c0_15, %c0_16] : memref<96x128xbf16, #tpu.memory_space<vmem>>, vector<96x128xbf16>
      tpu.vector_store %arg6[%c0_15, %c0_16], %18 {strides = array<i32>} : memref<96x128xbf16, #tpu.memory_space<vmem>>, vector<96x128xbf16>,
    } else {
    }
    return
  }
  func.func @transform_0(%arg0: i32, %arg1: i32, %arg2: i32) -> (i32, i32) {
    %c0_i32 = arith.constant 0 : i32
    return %arg0, %arg2 : i32, i32
  }
  func.func @transform_1(%arg0: i32, %arg1: i32, %arg2: i32) -> (i32, i32) {
    %c0_i32 = arith.constant 0 : i32
    return %arg2, %arg1 : i32, i32
  }
  func.func @transform_2(%arg0: i32, %arg1: i32, %arg2: i32) -> (i32, i32) {
    %c0_i32 = arith.constant 0 : i32
    %c0_i32_0 = arith.constant 0 : i32
    return %c0_i32, %arg1 : i32, i32
  }
  func.func @transform_3(%arg0: i32, %arg1: i32, %arg2: i32) -> (i32, i32) {
    %c0_i32 = arith.constant 0 : i32
    return %arg0, %arg1 : i32, i32
  }
}

module attributes {stable_mosaic.version = 11 : i64} {
  func.func @_mm_bias_act_kernel(%arg0: i32, %arg1: i32, %arg2: i32, %arg3: memref<96x256xbf16, #tpu.memory_space<vmem>>, %arg4: memref<256x128xbf16, #tpu.memory_space<vmem>>, %arg5: memref<1x128xf32, #tpu.memory_space<vmem>>, %arg6: memref<96x128xbf16, #tpu.memory_space<vmem>>, %arg7: memref<96x128xf32, #tpu.memory_space<vmem>>) attributes {dimension_semantics = [#tpu.dimension_semantics<parallel>, #tpu.dimension_semantics<parallel>, #tpu.dimension_semantics<arbitrary>], iteration_bounds = array<i64: 1, 1, 1>, scalar_prefetch = 0 : i64, scratch_operands = 1 : i64, tpu.core_type = #tpu.core_type<tc>, window_params = [{transform_indices = @transform_0, window_bounds = array<i64: 96, 256>}, {transform_indices = @transform_1, window_bounds = array<i64: 256, 128>}, {transform_indices = @transform_2, window_bounds = array<i64: 1, 128>}, {transform_indices = @transform_3, window_bounds = array<i64: 96, 128>}]} {
    %c0_i32 = arith.constant 0 : i32
    %0 = arith.cmpi eq, %arg2, %c0_i32 : i32
    %1 = arith.extui %0 : i1 to i32
    %c0_i32_0 = arith.constant 0 : i32
    %2 = arith.cmpi ne, %1, %c0_i32_0 : i32
    scf.if %2 {
      %cst_10 = arith.constant 0.000000e+00 : f32
      %12 = vector.broadcast %cst_10 : f32 to vector<96x128xf32>
      %c0_11 = arith.constant 0 : index
      %c0_12 = arith.constant 0 : index
      %13 = vector.load %arg7[%c0_11, %c0_12] : memref<96x128xf32, #tpu.memory_space<vmem>>, vector<96x128xf32>
      tpu.vector_store %arg7[%c0_11, %c0_12], %12 {strides = array<i32>} : memref<96x128xf32, #tpu.memory_space<vmem>>, vector<96x128xf32>,
    } else {
    }
    %c0 = arith.constant 0 : index
    %c0_1 = arith.constant 0 : index
    %3 = vector.load %arg7[%c0, %c0_1] : memref<96x128xf32, #tpu.memory_space<vmem>>, vector<96x128xf32>
    %c0_2 = arith.constant 0 : index
    %c0_3 = arith.constant 0 : index
    %4 = vector.load %arg3[%c0_2, %c0_3] : memref<96x256xbf16, #tpu.memory_space<vmem>>, vector<96x256xbf16>
    %c0_4 = arith.constant 0 : index
    %c0_5 = arith.constant 0 : index
    %5 = vector.load %arg4[%c0_4, %c0_5] : memref<256x128xbf16, #tpu.memory_space<vmem>>, vector<256x128xbf16>
    %cst = arith.constant dense<0.000000e+00> : vector<96x128xf32>
    %6 = tpu.matmul %4, %5, %cst {dimension_numbers = #tpu.dot_dimension_numbers<[1], [0], [0], [1], [0, 0, 1, 1], [], []>} : vector<96x256xbf16>, vector<256x128xbf16>, vector<96x128xf32> -> vector<96x128xf32>
    %7 = arith.addf %3, %6 : vector<96x128xf32>
    %c0_6 = arith.constant 0 : index
    %c0_7 = arith.constant 0 : index
    %8 = vector.load %arg7[%c0_6, %c0_7] : memref<96x128xf32, #tpu.memory_space<vmem>>, vector<96x128xf32>
    tpu.vector_store %arg7[%c0_6, %c0_7], %7 {strides = array<i32>} : memref<96x128xf32, #tpu.memory_space<vmem>>, vector<96x128xf32>,
    %c0_i32_8 = arith.constant 0 : i32
    %9 = arith.cmpi eq, %arg2, %c0_i32_8 : i32
    %10 = arith.extui %9 : i1 to i32
    %c0_i32_9 = arith.constant 0 : i32
    %11 = arith.cmpi ne, %10, %c0_i32_9 : i32
    scf.if %11 {
      %c0_10 = arith.constant 0 : index
      %c0_11 = arith.constant 0 : index
      %12 = vector.load %arg7[%c0_10, %c0_11] : memref<96x128xf32, #tpu.memory_space<vmem>>, vector<96x128xf32>
      %c0_12 = arith.constant 0 : index
      %c0_13 = arith.constant 0 : index
      %13 = vector.load %arg5[%c0_12, %c0_13] : memref<1x128xf32, #tpu.memory_space<vmem>>, vector<1x128xf32>
      %14 = vector.broadcast %13 : vector<1x128xf32> to vector<96x128xf32>
      %15 = arith.addf %12, %14 : vector<96x128xf32>
      %cst_14 = arith.constant 0.000000e+00 : f32
      %16 = vector.broadcast %cst_14 : f32 to vector<96x128xf32>
      %17 = arith.maximumf %15, %16 : vector<96x128xf32>
      %18 = arith.truncf %17 : vector<96x128xf32> to vector<96x128xbf16>
      %c0_15 = arith.constant 0 : index
      %c0_16 = arith.constant 0 : index
      %19 = vector.load %arg6[%c0_15, %c0_16] : memref<96x128xbf16, #tpu.memory_space<vmem>>, vector<96x128xbf16>
      tpu.vector_store %arg6[%c0_15, %c0_16], %18 {strides = array<i32>} : memref<96x128xbf16, #tpu.memory_space<vmem>>, vector<96x128xbf16>,
    } else {
    }
    return
  }
  func.func @transform_0(%arg0: i32, %arg1: i32, %arg2: i32) -> (i32, i32) {
    %c0_i32 = arith.constant 0 : i32
    return %arg0, %arg2 : i32, i32
  }
  func.func @transform_1(%arg0: i32, %arg1: i32, %arg2: i32) -> (i32, i32) {
    %c0_i32 = arith.constant 0 : i32
    return %arg2, %arg1 : i32, i32
  }
  func.func @transform_2(%arg0: i32, %arg1: i32, %arg2: i32) -> (i32, i32) {
    %c0_i32 = arith.constant 0 : i32
    %c0_i32_0 = arith.constant 0 : i32
    return %c0_i32, %arg1 : i32, i32
  }
  func.func @transform_3(%arg0: i32, %arg1: i32, %arg2: i32) -> (i32, i32) {
    %c0_i32 = arith.constant 0 : i32
    return %arg0, %arg1 : i32, i32
  }
}

module attributes {stable_mosaic.version = 11 : i64} {
  func.func @_fc_critic_kernel(%arg0: i32, %arg1: i32, %arg2: memref<8x384xbf16, #tpu.memory_space<vmem>>, %arg3: memref<384x128xbf16, #tpu.memory_space<vmem>>, %arg4: memref<1x128xf32, #tpu.memory_space<vmem>>, %arg5: memref<128x128xf32, #tpu.memory_space<vmem>>, %arg6: memref<1x128xf32, #tpu.memory_space<vmem>>, %arg7: memref<8x128xf32, #tpu.memory_space<vmem>>, %arg8: memref<8x128xf32, #tpu.memory_space<vmem>>, %arg9: memref<8x128xf32, #tpu.memory_space<vmem>>) attributes {dimension_semantics = [#tpu.dimension_semantics<parallel>, #tpu.dimension_semantics<arbitrary>], iteration_bounds = array<i64: 1, 2>, scalar_prefetch = 0 : i64, scratch_operands = 1 : i64, tpu.core_type = #tpu.core_type<tc>, window_params = [{transform_indices = @transform_0, window_bounds = array<i64: 8, 384>}, {transform_indices = @transform_1, window_bounds = array<i64: 384, 128>}, {pipeline_mode = #tpu.pipeline_mode<synchronous>, transform_indices = @transform_2, window_bounds = array<i64: 1, 128>}, {pipeline_mode = #tpu.pipeline_mode<synchronous>, transform_indices = @transform_3, window_bounds = array<i64: 128, 128>}, {pipeline_mode = #tpu.pipeline_mode<synchronous>, transform_indices = @transform_4, window_bounds = array<i64: 1, 128>}, {transform_indices = @transform_5, window_bounds = array<i64: 8, 128>}, {transform_indices = @transform_6, window_bounds = array<i64: 8, 128>}]} {
    %c0_i32 = arith.constant 0 : i32
    %0 = arith.cmpi eq, %arg1, %c0_i32 : i32
    %1 = arith.extui %0 : i1 to i32
    %c0_i32_0 = arith.constant 0 : i32
    %2 = arith.cmpi ne, %1, %c0_i32_0 : i32
    scf.if %2 {
      %cst_9 = arith.constant 0.000000e+00 : f32
      %12 = vector.broadcast %cst_9 : f32 to vector<8x128xf32>
      %c0_10 = arith.constant 0 : index
      %c0_11 = arith.constant 0 : index
      %13 = vector.load %arg9[%c0_10, %c0_11] : memref<8x128xf32, #tpu.memory_space<vmem>>, vector<8x128xf32>
      tpu.vector_store %arg9[%c0_10, %c0_11], %12 {strides = array<i32>} : memref<8x128xf32, #tpu.memory_space<vmem>>, vector<8x128xf32>,
    } else {
    }
    %c0 = arith.constant 0 : index
    %c0_1 = arith.constant 0 : index
    %3 = vector.load %arg9[%c0, %c0_1] : memref<8x128xf32, #tpu.memory_space<vmem>>, vector<8x128xf32>
    %c0_2 = arith.constant 0 : index
    %c0_3 = arith.constant 0 : index
    %4 = vector.load %arg2[%c0_2, %c0_3] : memref<8x384xbf16, #tpu.memory_space<vmem>>, vector<8x384xbf16>
    %c0_4 = arith.constant 0 : index
    %c0_5 = arith.constant 0 : index
    %5 = vector.load %arg3[%c0_4, %c0_5] : memref<384x128xbf16, #tpu.memory_space<vmem>>, vector<384x128xbf16>
    %cst = arith.constant dense<0.000000e+00> : vector<8x128xf32>
    %6 = tpu.matmul %4, %5, %cst {dimension_numbers = #tpu.dot_dimension_numbers<[1], [0], [0], [1], [0, 0, 1, 1], [], []>} : vector<8x384xbf16>, vector<384x128xbf16>, vector<8x128xf32> -> vector<8x128xf32>
    %7 = arith.addf %3, %6 : vector<8x128xf32>
    %c0_6 = arith.constant 0 : index
    %c0_7 = arith.constant 0 : index
    %8 = vector.load %arg9[%c0_6, %c0_7] : memref<8x128xf32, #tpu.memory_space<vmem>>, vector<8x128xf32>
    tpu.vector_store %arg9[%c0_6, %c0_7], %7 {strides = array<i32>} : memref<8x128xf32, #tpu.memory_space<vmem>>, vector<8x128xf32>,
    %c1_i32 = arith.constant 1 : i32
    %9 = arith.cmpi eq, %arg1, %c1_i32 : i32
    %10 = arith.extui %9 : i1 to i32
    %c0_i32_8 = arith.constant 0 : i32
    %11 = arith.cmpi ne, %10, %c0_i32_8 : i32
    scf.if %11 {
      %c0_9 = arith.constant 0 : index
      %c0_10 = arith.constant 0 : index
      %12 = vector.load %arg9[%c0_9, %c0_10] : memref<8x128xf32, #tpu.memory_space<vmem>>, vector<8x128xf32>
      %c0_11 = arith.constant 0 : index
      %c0_12 = arith.constant 0 : index
      %13 = vector.load %arg4[%c0_11, %c0_12] : memref<1x128xf32, #tpu.memory_space<vmem>>, vector<1x128xf32>
      %14 = vector.broadcast %13 : vector<1x128xf32> to vector<8x128xf32>
      %15 = arith.addf %12, %14 : vector<8x128xf32>
      %cst_13 = arith.constant 0.000000e+00 : f32
      %16 = vector.broadcast %cst_13 : f32 to vector<8x128xf32>
      %17 = arith.maximumf %15, %16 : vector<8x128xf32>
      %c0_14 = arith.constant 0 : index
      %c0_15 = arith.constant 0 : index
      %18 = vector.load %arg7[%c0_14, %c0_15] : memref<8x128xf32, #tpu.memory_space<vmem>>, vector<8x128xf32>
      tpu.vector_store %arg7[%c0_14, %c0_15], %17 {strides = array<i32>} : memref<8x128xf32, #tpu.memory_space<vmem>>, vector<8x128xf32>,
      %c0_16 = arith.constant 0 : index
      %c0_17 = arith.constant 0 : index
      %19 = vector.load %arg5[%c0_16, %c0_17] : memref<128x128xf32, #tpu.memory_space<vmem>>, vector<128x128xf32>
      %cst_18 = arith.constant dense<0.000000e+00> : vector<8x128xf32>
      %20 = tpu.matmul %17, %19, %cst_18 {dimension_numbers = #tpu.dot_dimension_numbers<[1], [0], [0], [1], [0, 0, 1, 1], [], []>} : vector<8x128xf32>, vector<128x128xf32>, vector<8x128xf32> -> vector<8x128xf32>
      %c0_19 = arith.constant 0 : index
      %c0_20 = arith.constant 0 : index
      %21 = vector.load %arg6[%c0_19, %c0_20] : memref<1x128xf32, #tpu.memory_space<vmem>>, vector<1x128xf32>
      %22 = vector.broadcast %21 : vector<1x128xf32> to vector<8x128xf32>
      %23 = arith.addf %20, %22 : vector<8x128xf32>
      %c0_21 = arith.constant 0 : index
      %c0_22 = arith.constant 0 : index
      %24 = vector.load %arg8[%c0_21, %c0_22] : memref<8x128xf32, #tpu.memory_space<vmem>>, vector<8x128xf32>
      tpu.vector_store %arg8[%c0_21, %c0_22], %23 {strides = array<i32>} : memref<8x128xf32, #tpu.memory_space<vmem>>, vector<8x128xf32>,
    } else {
    }
    return
  }
  func.func @transform_0(%arg0: i32, %arg1: i32) -> (i32, i32) {
    %c0_i32 = arith.constant 0 : i32
    return %arg0, %arg1 : i32, i32
  }
  func.func @transform_1(%arg0: i32, %arg1: i32) -> (i32, i32) {
    %c0_i32 = arith.constant 0 : i32
    %c0_i32_0 = arith.constant 0 : i32
    return %arg1, %c0_i32 : i32, i32
  }
  func.func @transform_2(%arg0: i32, %arg1: i32) -> (i32, i32) {
    %c0_i32 = arith.constant 0 : i32
    %c0_i32_0 = arith.constant 0 : i32
    %c0_i32_1 = arith.constant 0 : i32
    return %c0_i32, %c0_i32_0 : i32, i32
  }
  func.func @transform_3(%arg0: i32, %arg1: i32) -> (i32, i32) {
    %c0_i32 = arith.constant 0 : i32
    %c0_i32_0 = arith.constant 0 : i32
    %c0_i32_1 = arith.constant 0 : i32
    return %c0_i32, %c0_i32_0 : i32, i32
  }
  func.func @transform_4(%arg0: i32, %arg1: i32) -> (i32, i32) {
    %c0_i32 = arith.constant 0 : i32
    %c0_i32_0 = arith.constant 0 : i32
    %c0_i32_1 = arith.constant 0 : i32
    return %c0_i32, %c0_i32_0 : i32, i32
  }
  func.func @transform_5(%arg0: i32, %arg1: i32) -> (i32, i32) {
    %c0_i32 = arith.constant 0 : i32
    %c0_i32_0 = arith.constant 0 : i32
    return %arg0, %c0_i32 : i32, i32
  }
  func.func @transform_6(%arg0: i32, %arg1: i32) -> (i32, i32) {
    %c0_i32 = arith.constant 0 : i32
    %c0_i32_0 = arith.constant 0 : i32
    return %arg0, %c0_i32 : i32, i32
  }
}

</mosaic_0001>

<bundles_post_ra>
// kernel: forward.3
= control target key start
LH: loop header
LB: loop body
LE: loop exit
PB: predicated region body
PF: predicated region fallthrough
CT: control target
= control target key end

     0   :  { %s501_s1 = inlined_call_operand.vmem [shape: bf16[128,128], index: 1, kind: input, shape index: {}]   ;;  %s502_s2 = inlined_call_operand.vmem [shape: f32[1,128], index: 2, kind: input, shape index: {}]   ;;  %s503_s0 = inlined_call_operand.vmem [shape: bf16[96,128], index: 0, kind: input, shape index: {}]   ;;  %s504_s3 = inlined_call_operand.vmem [shape: bf16[96,128], index: 3, kind: output, shape index: {}]  }
   0x1   :  { %v357_v0 = vld [vmem:[%s501_s1 + $0x38] sm:$0xff]  ;;  %v356_v1 = vld [vmem:[%s501_s1 + $0x30] sm:$0xff]  ;;  %v355_v2 = vld [vmem:[%s501_s1 + $0x28] sm:$0xff] }
   0x2   :  { %394 = vmatpush.bf16.msra.mxu2 %v357_v0  ;;  %395 = vmatpush.bf16.msra.mxu3 %v357_v0  ;;  %v354_v3 = vld [vmem:[%s501_s1 + $0x20] sm:$0xff]  ;;  %v353_v4 = vld [vmem:[%s501_s1 + $0x18] sm:$0xff]  ;;  %v352_v5 = vld [vmem:[%s501_s1 + $0x10] sm:$0xff] }
   0x3   :  { %154 = vmatpush.bf16.msra.mxu0 %v357_v0  ;;  %393 = vmatpush.bf16.msra.mxu1 %v357_v0  ;;  %v351_v6 = vld [vmem:[%s501_s1 + $0x8] sm:$0xff]  ;;  %v350_v7 = vld [vmem:[%s501_s1] sm:$0xff]  ;;  %v346_v8 = vld [vmem:[%s503_s0 + $0x10] sm:$0xff] }
   0x4   :  { %v348_v9 = vld [vmem:[%s503_s0 + $0x20] sm:$0xff]  ;;  %v345_v11 = vld [vmem:[%s503_s0 + $0x8] sm:$0xff]  ;;  %v347_v12 = vld [vmem:[%s503_s0 + $0x18] sm:$0xff] }
   0x5   :  { %v344_v10 = vld [vmem:[%s503_s0] sm:$0xff]  ;;  %v349_v13 = vld [vmem:[%s503_s0 + $0x28] sm:$0xff] }
   0x6   :  { %397 = vmatpush.bf16.msra.mxu2 %v356_v1  ;;  %398 = vmatpush.bf16.msra.mxu3 %v356_v1  ;;  %v417_v16 = vld [vmem:[%s502_s2] ss:$0 sm:$0xff] }
   0x7   :  { %155 = vmatpush.bf16.msra.mxu0 %v356_v1  ;;  %396 = vmatpush.bf16.msra.mxu1 %v356_v1 }
   0xa   :  { %400 = vmatpush.bf16.msra.mxu2 %v355_v2  ;;  %401 = vmatpush.bf16.msra.mxu3 %v355_v2 }
   0xb   :  { %156 = vmatpush.bf16.msra.mxu0 %v355_v2  ;;  %399 = vmatpush.bf16.msra.mxu1 %v355_v2 }
   0xe   :  { %403 = vmatpush.bf16.msra.mxu2 %v354_v3  ;;  %404 = vmatpush.bf16.msra.mxu3 %v354_v3 }
   0xf   :  { %157 = vmatpush.bf16.msra.mxu0 %v354_v3  ;;  %402 = vmatpush.bf16.msra.mxu1 %v354_v3 }
  0x12   :  { %406 = vmatpush.bf16.msra.mxu2 %v353_v4  ;;  %407 = vmatpush.bf16.msra.mxu3 %v353_v4 }
  0x13   :  { %158 = vmatpush.bf16.msra.mxu0 %v353_v4  ;;  %405 = vmatpush.bf16.msra.mxu1 %v353_v4 }
  0x16   :  { %409 = vmatpush.bf16.msra.mxu2 %v352_v5  ;;  %410 = vmatpush.bf16.msra.mxu3 %v352_v5 }
  0x17   :  { %159 = vmatpush.bf16.msra.mxu0 %v352_v5  ;;  %408 = vmatpush.bf16.msra.mxu1 %v352_v5 }
  0x1a   :  { %412 = vmatpush.bf16.msra.mxu2 %v351_v6  ;;  %413 = vmatpush.bf16.msra.mxu3 %v351_v6 }
  0x1b   :  { %160 = vmatpush.bf16.msra.mxu0 %v351_v6  ;;  %411 = vmatpush.bf16.msra.mxu1 %v351_v6 }
  0x1e   :  { %415 = vmatpush.bf16.msra.mxu2 %v350_v7  ;;  %416 = vmatpush.bf16.msra.mxu3 %v350_v7 }
  0x1f   :  { %161 = vmatpush.bf16.msra.mxu0 %v350_v7  ;;  %414 = vmatpush.bf16.msra.mxu1 %v350_v7 }
  0x21   :  { %172 = vmatmul.bf16.vlgmr.msra.gmra.mxu2 %v346_v8  ;;  %182 = vmatmul.bf16.vlgmr.msra.gmra.mxu3 %v348_v9 }
  0x22   :  { %162 = vmatmul.bf16.vlgmr.msra.gmra.mxu0 %v344_v10  ;;  %167 = vmatmul.bf16.vlgmr.msra.gmra.mxu1 %v345_v11 }
  0x31   :  { %177 = vmatmul.bf16.gmra.mxu2 %v347_v12  ;;  %187 = vmatmul.bf16.gmra.mxu3 %v349_v13 }
  0x9f   :  { %v163_v14 = vpop.f32.mrf.mxu0  ;;  %v168_v15 = vpop.f32.mrf.mxu1 }
  0xa0   :  { %v236_v19 = vadd.f32 %v417_v16, %v163_v14  ;;  %v238_v20 = vadd.f32 %v417_v16, %v168_v15 }
  0xa2   :  { %v248_v23 = vmax.f32 %v236_v19, 0.0  ;;  %v250_v24 = vmax.f32 %v238_v20, 0.0 }
  0xa4   :  { %v173_v17 = vpop.f32.mrf.mxu2  ;;  %v183_v18 = vpop.f32.mrf.mxu3 }
  0xa5   :  { %v240_v29 = vadd.f32 %v417_v16, %v173_v17  ;;  %v244_v30 = vadd.f32 %v417_v16, %v183_v18 }
  0xa7   :  { %v165_v21 = vpop.f32.mrf.mxu0  ;;  %v170_v22 = vpop.f32.mrf.mxu1  ;;  %v252_v37 = vmax.f32 %v240_v29, 0.0  ;;  %v256_v38 = vmax.f32 %v244_v30, 0.0 }
  0xa8   :  { %v237_v25 = vadd.f32 %v417_v16, %v165_v21  ;;  %v239_v26 = vadd.f32 %v417_v16, %v170_v22 }
  0xaa   :  { %v249_v27 = vmax.f32 %v237_v25, 0.0  ;;  %v251_v28 = vmax.f32 %v239_v26, 0.0 }
  0xac   :  { %v175_v31 = vpop.f32.mrf.mxu2  ;;  %v185_v32 = vpop.f32.mrf.mxu3  ;;  %v361_v33 = vpack.c.bf16 %v249_v27, %v248_v23  ;;  %v366_v34 = vpack.c.bf16 %v251_v28, %v250_v24 }
  0xad   :  { %v241_v35 = vadd.f32 %v417_v16, %v175_v31  ;;  %v245_v36 = vadd.f32 %v417_v16, %v185_v32 }
  0xae   :  { %362 = vst [vmem:[%s504_s3] sm:$0xff] %v361_v33  }
  0xaf   :  { %v253_v39 = vmax.f32 %v241_v35, 0.0  ;;  %v257_v40 = vmax.f32 %v245_v36, 0.0  ;;  %388 = vst [vmem:[%s504_s3 + $0x8] sm:$0xff] %v366_v34  }
  0xb1   :  { %v371_v41 = vpack.c.bf16 %v253_v39, %v252_v37  ;;  %v381_v42 = vpack.c.bf16 %v257_v40, %v256_v38 }
  0xb3   :  { %389 = vst [vmem:[%s504_s3 + $0x10] sm:$0xff] %v371_v41  }
  0xb4   :  { %391 = vst [vmem:[%s504_s3 + $0x20] sm:$0xff] %v381_v42   ;;  %v178_v43 = vpop.f32.mrf.mxu2  ;;  %v188_v44 = vpop.f32.mrf.mxu3 }
  0xb5   :  { %v242_v45 = vadd.f32 %v417_v16, %v178_v43  ;;  %v246_v46 = vadd.f32 %v417_v16, %v188_v44 }
  0xb7   :  { %v254_v51 = vmax.f32 %v242_v45, 0.0  ;;  %v258_v52 = vmax.f32 %v246_v46, 0.0 }
  0xbc   :  { %v180_v47 = vpop.f32.mrf.mxu2  ;;  %v190_v48 = vpop.f32.mrf.mxu3 }
  0xbd   :  { %v243_v49 = vadd.f32 %v417_v16, %v180_v47  ;;  %v247_v50 = vadd.f32 %v417_v16, %v190_v48 }
  0xbf   :  { %v255_v53 = vmax.f32 %v243_v49, 0.0  ;;  %v259_v54 = vmax.f32 %v247_v50, 0.0 }
  0xc1   :  { %v376_v55 = vpack.c.bf16 %v255_v53, %v254_v51  ;;  %v386_v56 = vpack.c.bf16 %v259_v54, %v258_v52 }
  0xc3   :  { %390 = vst [vmem:[%s504_s3 + $0x18] sm:$0xff] %v376_v55  }
  0xc4   :  { %392 = vst [vmem:[%s504_s3 + $0x28] sm:$0xff] %v386_v56  }

// kernel: forward.4
= control target key start
LH: loop header
LB: loop body
LE: loop exit
PB: predicated region body
PF: predicated region fallthrough
CT: control target
= control target key end

     0   :  { %s782_s1 = inlined_call_operand.vmem [shape: bf16[256,128], index: 1, kind: input, shape index: {}]   ;;  %s783_s0 = inlined_call_operand.vmem [shape: bf16[96,256], index: 0, kind: input, shape index: {}]   ;;  %s784_s2 = inlined_call_operand.vmem [shape: f32[1,128], index: 2, kind: input, shape index: {}]   ;;  %s785_s3 = inlined_call_operand.vmem [shape: bf16[96,128], index: 3, kind: output, shape index: {}]  }
   0x1   :  { %v546_v0 = vld [vmem:[%s782_s1 + $0x38] sm:$0xff]  ;;  %v545_v2 = vld [vmem:[%s782_s1 + $0x30] sm:$0xff]  ;;  %v544_v4 = vld [vmem:[%s782_s1 + $0x28] sm:$0xff] }
   0x2   :  { %v554_v1 = vld [vmem:[%s782_s1 + $0x78] sm:$0xff]  ;;  %242 = vmatpush.bf16.msra.mxu0 %v546_v0  ;;  %590 = vmatpush.bf16.msra.mxu2 %v546_v0  ;;  %v553_v3 = vld [vmem:[%s782_s1 + $0x70] sm:$0xff]  ;;  %v552_v5 = vld [vmem:[%s782_s1 + $0x68] sm:$0xff] }
   0x3   :  { %281 = vmatpush.bf16.msra.mxu1 %v554_v1  ;;  %598 = vmatpush.bf16.msra.mxu3 %v554_v1  ;;  %v543_v6 = vld [vmem:[%s782_s1 + $0x20] sm:$0xff]  ;;  %v542_v8 = vld [vmem:[%s782_s1 + $0x18] sm:$0xff]  ;;  %v541_v10 = vld [vmem:[%s782_s1 + $0x10] sm:$0xff] }
   0x4   :  { %v551_v7 = vld [vmem:[%s782_s1 + $0x60] sm:$0xff]  ;;  %v550_v9 = vld [vmem:[%s782_s1 + $0x58] sm:$0xff]  ;;  %v549_v11 = vld [vmem:[%s782_s1 + $0x50] sm:$0xff] }
   0x5   :  { %v540_v12 = vld [vmem:[%s782_s1 + $0x8] sm:$0xff]  ;;  %v539_v14 = vld [vmem:[%s782_s1] sm:$0xff]  ;;  %v441_v18 = vld [vmem:[%s783_s0 + $0x30] sm:$0xf] }
   0x6   :  { %243 = vmatpush.bf16.msra.mxu0 %v545_v2  ;;  %591 = vmatpush.bf16.msra.mxu2 %v545_v2  ;;  %v548_v13 = vld [vmem:[%s782_s1 + $0x48] sm:$0xff]  ;;  %v547_v15 = vld [vmem:[%s782_s1 + $0x40] sm:$0xff]  ;;  %v534_v19 = vld [vmem:[%s783_s0 + $0x34] sm:$0xf0] }
   0x7   :  { %282 = vmatpush.bf16.msra.mxu1 %v553_v3  ;;  %599 = vmatpush.bf16.msra.mxu3 %v553_v3  ;;  %v417_v16 = vld [vmem:[%s783_s0] sm:$0xf]  ;;  %v528_v17 = vld [vmem:[%s783_s0 + $0x4] sm:$0xf0]  ;;  %v527_v20 = vld [vmem:[%s783_s0 + $0x4] sm:$0xf]  ;;  %v442_v25 = vor.u32 %v534_v19, %v441_v18 }
   0x8   :  { %v419_v21 = vld [vmem:[%s783_s0 + $0x8] sm:$0xf0]  ;;  %v533_v22 = vld [vmem:[%s783_s0 + $0x34] sm:$0xf]  ;;  %v443_v23 = vld [vmem:[%s783_s0 + $0x38] sm:$0xf0]  ;;  %v418_v24 = vor.u32 %v528_v17, %v417_v16 }
   0x9   :  { %v422_v26 = vor.u32 %v527_v20, %v419_v21  ;;  %v446_v27 = vor.u32 %v533_v22, %v443_v23  ;;  %v425_v28 = vld [vmem:[%s783_s0 + $0x10] sm:$0xf]  ;;  %v530_v29 = vld [vmem:[%s783_s0 + $0x14] sm:$0xf0]  ;;  %v449_v30 = vld [vmem:[%s783_s0 + $0x40] sm:$0xf] }
   0xa   :  { %244 = vmatpush.bf16.msra.mxu0 %v544_v4  ;;  %592 = vmatpush.bf16.msra.mxu2 %v544_v4  ;;  %v536_v31 = vld [vmem:[%s783_s0 + $0x44] sm:$0xf0]  ;;  %v529_v32 = vld [vmem:[%s783_s0 + $0x14] sm:$0xf]  ;;  %v427_v33 = vld [vmem:[%s783_s0 + $0x18] sm:$0xf0]  ;;  %v426_v36 = vor.u32 %v530_v29, %v425_v28 }
   0xb   :  { %283 = vmatpush.bf16.msra.mxu1 %v552_v5  ;;  %600 = vmatpush.bf16.msra.mxu3 %v552_v5  ;;  %v535_v34 = vld [vmem:[%s783_s0 + $0x44] sm:$0xf]  ;;  %v451_v35 = vld [vmem:[%s783_s0 + $0x48] sm:$0xf0]  ;;  %v450_v37 = vor.u32 %v536_v31, %v449_v30  ;;  %v430_v38 = vor.u32 %v529_v32, %v427_v33  ;;  %v433_v40 = vld [vmem:[%s783_s0 + $0x20] sm:$0xf] }
   0xc   :  { %v454_v39 = vor.u32 %v535_v34, %v451_v35  ;;  %v532_v41 = vld [vmem:[%s783_s0 + $0x24] sm:$0xf0]  ;;  %v457_v42 = vld [vmem:[%s783_s0 + $0x50] sm:$0xf]  ;;  %v538_v43 = vld [vmem:[%s783_s0 + $0x54] sm:$0xf0] }
   0xd   :  { %v531_v44 = vld [vmem:[%s783_s0 + $0x24] sm:$0xf]  ;;  %v435_v45 = vld [vmem:[%s783_s0 + $0x28] sm:$0xf0]  ;;  %v537_v46 = vld [vmem:[%s783_s0 + $0x54] sm:$0xf]  ;;  %v434_v48 = vor.u32 %v532_v41, %v433_v40  ;;  %v458_v49 = vor.u32 %v538_v43, %v457_v42 }
   0xe   :  { %245 = vmatpush.bf16.msra.mxu0 %v543_v6  ;;  %593 = vmatpush.bf16.msra.mxu2 %v543_v6  ;;  %v459_v47 = vld [vmem:[%s783_s0 + $0x58] sm:$0xf0]  ;;  %v438_v50 = vor.u32 %v531_v44, %v435_v45  ;;  %v750_v55 = vld [vmem:[%s784_s2] ss:$0 sm:$0xff] }
   0xf   :  { %284 = vmatpush.bf16.msra.mxu1 %v551_v7  ;;  %601 = vmatpush.bf16.msra.mxu3 %v551_v7  ;;  %v462_v51 = vor.u32 %v537_v46, %v459_v47 }
  0x12   :  { %246 = vmatpush.bf16.msra.mxu0 %v542_v8  ;;  %594 = vmatpush.bf16.msra.mxu2 %v542_v8 }
  0x13   :  { %285 = vmatpush.bf16.msra.mxu1 %v550_v9  ;;  %602 = vmatpush.bf16.msra.mxu3 %v550_v9 }
  0x16   :  { %247 = vmatpush.bf16.msra.mxu0 %v541_v10  ;;  %595 = vmatpush.bf16.msra.mxu2 %v541_v10 }
  0x17   :  { %286 = vmatpush.bf16.msra.mxu1 %v549_v11  ;;  %603 = vmatpush.bf16.msra.mxu3 %v549_v11 }
  0x1a   :  { %248 = vmatpush.bf16.msra.mxu0 %v540_v12  ;;  %596 = vmatpush.bf16.msra.mxu2 %v540_v12 }
  0x1b   :  { %287 = vmatpush.bf16.msra.mxu1 %v548_v13  ;;  %604 = vmatpush.bf16.msra.mxu3 %v548_v13 }
  0x1e   :  { %249 = vmatpush.bf16.msra.mxu0 %v539_v14  ;;  %597 = vmatpush.bf16.msra.mxu2 %v539_v14 }
  0x1f   :  { %288 = vmatpush.bf16.msra.mxu1 %v547_v15  ;;  %605 = vmatpush.bf16.msra.mxu3 %v547_v15 }
  0x21   :  { %250 = vmatmul.bf16.vlgmr.msra.gmra.mxu0 %v418_v24  ;;  %265 = vmatmul.bf16.vlgmr.msra.gmra.mxu2 %v442_v25 }
  0x22   :  { %289 = vmatmul.bf16.vlgmr.msra.gmra.mxu1 %v422_v26  ;;  %304 = vmatmul.bf16.vlgmr.msra.gmra.mxu3 %v446_v27 }
  0x31   :  { %255 = vmatmul.bf16.gmra.mxu0 %v426_v36  ;;  %270 = vmatmul.bf16.gmra.mxu2 %v450_v37 }
  0x32   :  { %294 = vmatmul.bf16.gmra.mxu1 %v430_v38  ;;  %309 = vmatmul.bf16.gmra.mxu3 %v454_v39 }
  0x41   :  { %260 = vmatmul.bf16.gmra.mxu0 %v434_v48  ;;  %275 = vmatmul.bf16.gmra.mxu2 %v458_v49 }
  0x42   :  { %299 = vmatmul.bf16.gmra.mxu1 %v438_v50  ;;  %314 = vmatmul.bf16.gmra.mxu3 %v462_v51 }
  0x9e   :  { %v251_v52 = vpop.f32.mrf.mxu0 }
  0x9f   :  { %v290_v53 = vpop.f32.mrf.mxu1 }
  0xa0   :  { %v291_v54 = vadd.f32 %v290_v53, %v251_v52 }
  0xa2   :  { %v363_v60 = vadd.f32 %v750_v55, %v291_v54 }
  0xa4   :  { %v266_v56 = vpop.f32.mrf.mxu2  ;;  %v375_v0 = vmax.f32 %v363_v60, 0.0 }
  0xa5   :  { %v305_v57 = vpop.f32.mrf.mxu3 }
  0xa6   :  { %v253_v58 = vpop.f32.mrf.mxu0  ;;  %v306_v62 = vadd.f32 %v305_v57, %v266_v56 }
  0xa7   :  { %v292_v59 = vpop.f32.mrf.mxu1 }
  0xa8   :  { %v293_v61 = vadd.f32 %v292_v59, %v253_v58  ;;  %v369_v4 = vadd.f32 %v750_v55, %v306_v62 }
  0xaa   :  { %v364_v63 = vadd.f32 %v750_v55, %v293_v61  ;;  %v381_v10 = vmax.f32 %v369_v4, 0.0 }
  0xac   :  { %v376_v1 = vmax.f32 %v364_v63, 0.0  ;;  %v268_v2 = vpop.f32.mrf.mxu2 }
  0xad   :  { %v307_v3 = vpop.f32.mrf.mxu3 }
  0xae   :  { %v558_v5 = vpack.c.bf16 %v376_v1, %v375_v0  ;;  %v308_v6 = vadd.f32 %v307_v3, %v268_v2  ;;  %v256_v7 = vpop.f32.mrf.mxu0 }
  0xaf   :  { %v295_v8 = vpop.f32.mrf.mxu1 }
  0xb0   :  { %559 = vst [vmem:[%s785_s3] sm:$0xff] %v558_v5   ;;  %v370_v9 = vadd.f32 %v750_v55, %v308_v6  ;;  %v296_v13 = vadd.f32 %v295_v8, %v256_v7 }
  0xb2   :  { %v382_v11 = vmax.f32 %v370_v9, 0.0  ;;  %v365_v18 = vadd.f32 %v750_v55, %v296_v13 }
  0xb4   :  { %v573_v12 = vpack.c.bf16 %v382_v11, %v381_v10  ;;  %v271_v14 = vpop.f32.mrf.mxu2  ;;  %v377_v22 = vmax.f32 %v365_v18, 0.0 }
  0xb5   :  { %v310_v15 = vpop.f32.mrf.mxu3 }
  0xb6   :  { %587 = vst [vmem:[%s785_s3 + $0x18] sm:$0xff] %v573_v12   ;;  %v258_v16 = vpop.f32.mrf.mxu0  ;;  %v311_v20 = vadd.f32 %v310_v15, %v271_v14 }
  0xb7   :  { %v297_v17 = vpop.f32.mrf.mxu1 }
  0xb8   :  { %v298_v19 = vadd.f32 %v297_v17, %v258_v16  ;;  %v371_v26 = vadd.f32 %v750_v55, %v311_v20 }
  0xba   :  { %v366_v21 = vadd.f32 %v750_v55, %v298_v19  ;;  %v383_v32 = vmax.f32 %v371_v26, 0.0 }
  0xbc   :  { %v378_v23 = vmax.f32 %v366_v21, 0.0  ;;  %v273_v24 = vpop.f32.mrf.mxu2 }
  0xbd   :  { %v312_v25 = vpop.f32.mrf.mxu3 }
  0xbe   :  { %v563_v27 = vpack.c.bf16 %v378_v23, %v377_v22  ;;  %v313_v28 = vadd.f32 %v312_v25, %v273_v24  ;;  %v261_v29 = vpop.f32.mrf.mxu0 }
  0xbf   :  { %v300_v30 = vpop.f32.mrf.mxu1 }
  0xc0   :  { %585 = vst [vmem:[%s785_s3 + $0x8] sm:$0xff] %v563_v27   ;;  %v372_v31 = vadd.f32 %v750_v55, %v313_v28  ;;  %v301_v35 = vadd.f32 %v300_v30, %v261_v29 }
  0xc2   :  { %v384_v33 = vmax.f32 %v372_v31, 0.0  ;;  %v367_v40 = vadd.f32 %v750_v55, %v301_v35 }
  0xc4   :  { %v578_v34 = vpack.c.bf16 %v384_v33, %v383_v32  ;;  %v276_v36 = vpop.f32.mrf.mxu2  ;;  %v379_v44 = vmax.f32 %v367_v40, 0.0 }
  0xc5   :  { %v315_v37 = vpop.f32.mrf.mxu3 }
  0xc6   :  { %588 = vst [vmem:[%s785_s3 + $0x20] sm:$0xff] %v578_v34   ;;  %v263_v38 = vpop.f32.mrf.mxu0  ;;  %v316_v42 = vadd.f32 %v315_v37, %v276_v36 }
  0xc7   :  { %v302_v39 = vpop.f32.mrf.mxu1 }
  0xc8   :  { %v303_v41 = vadd.f32 %v302_v39, %v263_v38  ;;  %v373_v48 = vadd.f32 %v750_v55, %v316_v42 }
  0xca   :  { %v368_v43 = vadd.f32 %v750_v55, %v303_v41  ;;  %v385_v52 = vmax.f32 %v373_v48, 0.0 }
  0xcc   :  { %v380_v45 = vmax.f32 %v368_v43, 0.0  ;;  %v278_v46 = vpop.f32.mrf.mxu2 }
  0xcd   :  { %v317_v47 = vpop.f32.mrf.mxu3 }
  0xce   :  { %v568_v49 = vpack.c.bf16 %v380_v45, %v379_v44  ;;  %v318_v50 = vadd.f32 %v317_v47, %v278_v46 }
  0xd0   :  { %586 = vst [vmem:[%s785_s3 + $0x10] sm:$0xff] %v568_v49   ;;  %v374_v51 = vadd.f32 %v750_v55, %v318_v50 }
  0xd2   :  { %v386_v53 = vmax.f32 %v374_v51, 0.0 }
  0xd4   :  { %v583_v54 = vpack.c.bf16 %v386_v53, %v385_v52 }
  0xd6   :  { %589 = vst [vmem:[%s785_s3 + $0x28] sm:$0xff] %v583_v54  }

// kernel: forward.5
= control target key start
LH: loop header
LB: loop body
LE: loop exit
PB: predicated region body
PF: predicated region fallthrough
CT: control target
= control target key end

     0   :  { %s940_s21 = smov 0   ;;  %s942_s22 = smov 0   ;;  %s1069_s0 = inlined_call_operand.vmem [shape: bf16[8,768], index: 0, kind: input, shape index: {}]   ;;  %s1070_s1 = inlined_call_operand.vmem [shape: bf16[768,128], index: 1, kind: input, shape index: {}]   ;;  %s1071_s2 = inlined_call_operand.vmem [shape: f32[1,128], index: 2, kind: input, shape index: {}]   ;;  %s1072_s3 = inlined_call_operand.vmem [shape: f32[128,128], index: 3, kind: input, shape index: {}]   ;;  %s1073_s4 = inlined_call_operand.vmem [shape: f32[1,128], index: 4, kind: input, shape index: {}]   ;;  %s1074_s5 = inlined_call_operand.vmem [shape: f32[8,128], index: 5, kind: output, shape index: {0}]   ;;  %s1075_s6 = inlined_call_operand.vmem [shape: f32[8,128], index: 6, kind: output, shape index: {1}]  }
   0x1   :  { %s944_s23 = smov 0  }
   0x2 LB: > { %s26_s24 = sadd.s32 1, %s898_s22  ;;  %p724_p0 = scmp.ge.s32.totalorder %s902_s23, 1  ;;  %s902_s23 = sphi %s944_s23, %s17_s23   ;;  %s898_s22 = sphi %s942_s22, %s1077_s22   ;;  %s894_s21 = sphi %s940_s21, %s1076_s21  }
   0x3   : > { %p27_p1 = scmp.ge.s32.totalorder %s26_s24, 2  ;;  %p245_p2 = scmp.lt.s32.totalorder %s902_s23, 3 }
   0x5   : > { %s1079_s24 = smov (%p27_p1, %s26_s24), 0  ;;  %p246_p3 = pnand %p724_p0, %p245_p2 }
   0x6   : > { %s287_s25 = smul.u32 (!%p246_p3), 3, %s894_s21  ;;  %p727_p6 = scmp.ne.s32.totalorder (!%p246_p3), %s894_s21, 0 }
   0x7   : > { %249 = sbr.rel (%p246_p3) target bundleno = 357 (0x165), region = 40 }
   0x8   : > { %s297_s26 = smul.u32 (!%p246_p3), 48, %s894_s21  ;;  %p290_p4 = scmp.lt.s32.totalorder (!%p246_p3), %s287_s25, 5 }
   0xa   : > { %p298_p5 = scmp.lt.s32.totalorder (!%p246_p3), %s297_s26, 95 }
   0xc   : > { %s1081_s25 = smov (!%p290_p4, %s287_s25), 5  ;;  %s1083_s26 = smov (!%p298_p5, %s297_s26), 95 }
   0xd   : > { %s725_s27 = sshll.u32 %s1081_s25, 2  ;;  %s726_s7 = sshll.u32 %s1083_s26, 2 }
   0xe   : > { %s965_s30 = scalar_lea.vmem %s1069_s0, %s725_s27  ;;  %s970_s10 = scalar_lea.vmem %s1070_s1, %s726_s7 }
   0xf   : > { %314 = sbr.rel (%p727_p6) target bundleno = 22 (0x16), region = 44 }
  0x14   : > { %v904_v0 = vmov 0.0  }
  0x15   : > { %315 = vst [vmem:[#allocation2] sm:$0xff] %v904_v0 }
  0x16 PF: > { %v836_v1 = vld [vmem:[%s970_s10 + $0x38] sm:$0xff]  ;;  %v835_v4 = vld [vmem:[%s970_s10 + $0x30] sm:$0xff]  ;;  %v834_v7 = vld [vmem:[%s970_s10 + $0x28] sm:$0xff]  ;;  %p824_p7 = scmp.ne.s32.totalorder %s894_s21, 1 }
  0x17   : > { %v844_v2 = vld [vmem:[%s970_s10 + $0x78] sm:$0xff]  ;;  %522 = vmatpush.bf16.msra.mxu0 %v836_v1  ;;  %v843_v5 = vld [vmem:[%s970_s10 + $0x70] sm:$0xff]  ;;  %v842_v8 = vld [vmem:[%s970_s10 + $0x68] sm:$0xff] }
  0x18   : > { %v852_v3 = vld [vmem:[%s970_s10 + $0xb8] sm:$0xff]  ;;  %535 = vmatpush.bf16.msra.mxu1 %v844_v2  ;;  %v851_v6 = vld [vmem:[%s970_s10 + $0xb0] sm:$0xff]  ;;  %v850_v9 = vld [vmem:[%s970_s10 + $0xa8] sm:$0xff] }
  0x19   : > { %548 = vmatpush.bf16.msra.mxu2 %v852_v3  ;;  %v833_v10 = vld [vmem:[%s970_s10 + $0x20] sm:$0xff]  ;;  %v832_v13 = vld [vmem:[%s970_s10 + $0x18] sm:$0xff]  ;;  %v831_v16 = vld [vmem:[%s970_s10 + $0x10] sm:$0xff] }
  0x1a   : > { %v841_v11 = vld [vmem:[%s970_s10 + $0x60] sm:$0xff]  ;;  %v840_v14 = vld [vmem:[%s970_s10 + $0x58] sm:$0xff]  ;;  %v839_v17 = vld [vmem:[%s970_s10 + $0x50] sm:$0xff] }
  0x1b   : > { %523 = vmatpush.bf16.msra.mxu0 %v835_v4  ;;  %v849_v12 = vld [vmem:[%s970_s10 + $0xa0] sm:$0xff]  ;;  %v848_v15 = vld [vmem:[%s970_s10 + $0x98] sm:$0xff]  ;;  %v847_v18 = vld [vmem:[%s970_s10 + $0x90] sm:$0xff] }
  0x1c   : > { %536 = vmatpush.bf16.msra.mxu1 %v843_v5  ;;  %v830_v19 = vld [vmem:[%s970_s10 + $0x8] sm:$0xff]  ;;  %v317_v21 = vld [vmem:[%s965_s30] sm:$0xff] }
  0x1d   : > { %549 = vmatpush.bf16.msra.mxu2 %v851_v6  ;;  %v838_v20 = vld [vmem:[%s970_s10 + $0x48] sm:$0xff]  ;;  %v369_v24 = vunpack.c.l.b16 %v317_v21  ;;  %v370_v25 = vunpack.c.h.b16 %v317_v21  ;;  %v829_v26 = vld [vmem:[%s970_s10] sm:$0xff] }
  0x1e   : > { %v846_v22 = vld [vmem:[%s970_s10 + $0x88] sm:$0xff]  ;;  %v837_v27 = vld [vmem:[%s970_s10 + $0x40] sm:$0xff] }
  0x1f   : > { %524 = vmatpush.bf16.msra.mxu0 %v834_v7  ;;  %v318_v23 = vld [vmem:[%s965_s30 + $0x8] sm:$0xf]  ;;  %v845_v29 = vld [vmem:[%s970_s10 + $0x80] sm:$0xff]  ;;  %v372_v30 = vpack.c.b16 %v369_v24, %v369_v24  ;;  %v373_v31 = vpack.c.b16 %v370_v25, %v370_v25 }
  0x20   : > { %537 = vmatpush.bf16.msra.mxu1 %v842_v8  ;;  %v371_v28 = vunpack.c.l.b16 %v318_v23  ;;  %v316_v36 = vld [vmem:[#allocation2] sm:$0xff] }
  0x21   : > { %550 = vmatpush.bf16.msra.mxu2 %v850_v9 }
  0x22   : > { %v374_v32 = vpack.c.b16 %v371_v28, %v371_v28 }
  0x23   : > { %525 = vmatpush.bf16.msra.mxu0 %v833_v10 }
  0x24   : > { %538 = vmatpush.bf16.msra.mxu1 %v841_v11 }
  0x25   : > { %551 = vmatpush.bf16.msra.mxu2 %v849_v12 }
  0x27   : > { %526 = vmatpush.bf16.msra.mxu0 %v832_v13 }
  0x28   : > { %539 = vmatpush.bf16.msra.mxu1 %v840_v14 }
  0x29   : > { %552 = vmatpush.bf16.msra.mxu2 %v848_v15 }
  0x2b   : > { %527 = vmatpush.bf16.msra.mxu0 %v831_v16 }
  0x2c   : > { %540 = vmatpush.bf16.msra.mxu1 %v839_v17 }
  0x2d   : > { %553 = vmatpush.bf16.msra.mxu2 %v847_v18 }
  0x2f   : > { %528 = vmatpush.bf16.msra.mxu0 %v830_v19 }
  0x30   : > { %541 = vmatpush.bf16.msra.mxu1 %v838_v20 }
  0x31   : > { %554 = vmatpush.bf16.msra.mxu2 %v846_v22 }
  0x33   : > { %529 = vmatpush.bf16.msra.mxu0 %v829_v26 }
  0x34   : > { %542 = vmatpush.bf16.msra.mxu1 %v837_v27 }
  0x35   : > { %555 = vmatpush.bf16.msra.mxu2 %v845_v29 }
  0x36   : > { %530 = vmatmul.bf16.vlgmr.msra.gmra.mxu0 %v372_v30 }
  0x37   : > { %543 = vmatmul.bf16.vlgmr.msra.gmra.mxu1 %v373_v31 }
  0x38   : > { %556 = vmatmul.bf16.vlgmr.msra.gmra.mxu2 %v374_v32 }
  0xb3   : > { %v531_v33 = vpop.f32.mrf.mxu0 }
  0xb4   : > { %v544_v34 = vpop.f32.mrf.mxu1 }
  0xb5   : > { %v545_v35 = vadd.f32 %v544_v34, %v531_v33 }
  0xbb   : > { %v557_v37 = vpop.f32.mrf.mxu2  ;;  %v533_v39 = vpop.f32.mrf.mxu0 }
  0xbc   : > { %v558_v38 = vadd.f32 %v557_v37, %v545_v35  ;;  %v546_v40 = vpop.f32.mrf.mxu1 }
  0xbe   : > { %v561_v41 = vadd.f32 %v558_v38, %v316_v36 }
  0xbf   : > { %566 = sbr.rel (%p824_p7) target bundleno = 357 (0x165), region = 48 }
  0xc0   : > { %562 = vst [vmem:[#allocation2] sm:$0xff] %v561_v41 }
  0xc3   : > { %v559_v42 = vpop.f32.mrf.mxu2 }
  0xc4   : > { %v590_v43 = vld [vmem:[%s1072_s3 + $0x78] sm:$0xff]  ;;  %v589_v44 = vld [vmem:[%s1072_s3 + $0x70] sm:$0xff]  ;;  %v588_v45 = vld [vmem:[%s1072_s3 + $0x68] sm:$0xff] }
  0xc5   : > { %595 = vmatpush.msra.mxu0 %v590_v43  ;;  %v587_v46 = vld [vmem:[%s1072_s3 + $0x60] sm:$0xff]  ;;  %v586_v48 = vld [vmem:[%s1072_s3 + $0x58] sm:$0xff]  ;;  %v585_v50 = vld [vmem:[%s1072_s3 + $0x50] sm:$0xff] }
  0xc6   : > { %v878_v49 = vld [vmem:[%s1071_s2] ss:$0 sm:$0xff]  ;;  %v584_v52 = vld [vmem:[%s1072_s3 + $0x48] sm:$0xff]  ;;  %v582_v55 = vld [vmem:[%s1072_s3 + $0x38] sm:$0xff] }
  0xc7   : > { %596 = vmatpush.msra.mxu0 %v589_v44  ;;  %v567_v47 = vld [vmem:[#allocation2] sm:$0xff]  ;;  %v581_v56 = vld [vmem:[%s1072_s3 + $0x30] sm:$0xff]  ;;  %v580_v57 = vld [vmem:[%s1072_s3 + $0x28] sm:$0xff] }
  0xc8   : > { %v572_v51 = vadd.f32 %v878_v49, %v567_v47  ;;  %v583_v54 = vld [vmem:[%s1072_s3 + $0x40] sm:$0xff]  ;;  %v578_v59 = vld [vmem:[%s1072_s3 + $0x18] sm:$0xff]  ;;  %v577_v60 = vld [vmem:[%s1072_s3 + $0x10] sm:$0xff] }
  0xc9   : > { %597 = vmatpush.msra.mxu0 %v588_v45  ;;  %v579_v58 = vld [vmem:[%s1072_s3 + $0x20] sm:$0xff]  ;;  %v576_v61 = vld [vmem:[%s1072_s3 + $0x8] sm:$0xff] }
  0xca   : > { %v573_v53 = vmax.f32 %v572_v51, 0.0  ;;  %v575_v62 = vld [vmem:[%s1072_s3] sm:$0xff] }
  0xcb   : > { %598 = vmatpush.msra.mxu0 %v587_v46  ;;  %v879_v63 = vld [vmem:[%s1073_s4] ss:$0 sm:$0xff] }
  0xcc   : > { %574 = vst [vmem:[%s1074_s5] sm:$0xff] %v573_v53 }
  0xcd   : > { %599 = vmatpush.msra.mxu0 %v586_v48 }
  0xcf   : > { %600 = vmatpush.msra.mxu0 %v585_v50 }
  0xd1   : > { %601 = vmatpush.msra.mxu0 %v584_v52 }
  0xd3   : > { %602 = vmatpush.msra.mxu0 %v583_v54 }
  0xd5   : > { %603 = vmatpush.msra.mxu0 %v582_v55 }
  0xd7   : > { %604 = vmatpush.msra.mxu0 %v581_v56 }
  0xd9   : > { %605 = vmatpush.msra.mxu0 %v580_v57 }
  0xdb   : > { %606 = vmatpush.msra.mxu0 %v579_v58 }
  0xdd   : > { %607 = vmatpush.msra.mxu0 %v578_v59 }
  0xdf   : > { %608 = vmatpush.msra.mxu0 %v577_v60 }
  0xe1   : > { %609 = vmatpush.msra.mxu0 %v576_v61 }
  0xe3   : > { %610 = vmatpush.msra.mxu0 %v575_v62 }
  0xe4   : > { %611 = vmatmul.f32.vlgmr.msra.gmra.mxu0 %v573_v53 }
 0x161   : > { %v612_v0 = vpop.f32.mrf.mxu0 }
 0x162   : > { %v613_v1 = vadd.f32 %v879_v63, %v612_v0 }
 0x164   : > { %615 = vst [vmem:[%s1075_s6] sm:$0xff] %v613_v1 }
 0x165 PF: > { %s17_s23 = sadd.s32 1, %s902_s23   ;;  %s1076_s21 = smov %s898_s22 }
 0x166   : > { %p14_p8 = scmp.ge.s32.totalorder %s17_s23, 4   ;;  %s1077_s22 = smov %s1079_s24 }
 0x168   :  { %16 = sbr.rel (!%p14_p8) target bundleno = 2 (0x2), region = 93 }

</bundles_post_ra>
